<compile_context>
chip_gen: v7x
topology: tpu7x:2x2x1
jax: 0.10.0
libtpu: 0.0.40
codegen_flags: <defaults>
</compile_context>

<pallas_src>
import functools
import math

import jax
import jax.numpy as jnp
from jax.experimental import pallas as pl
from jax.experimental.pallas import tpu as pltpu

LANES = 128
SUBLANES = 8
_MIN_BLOCK = SUBLANES * LANES  # 1024 samples = one f32 vreg footprint per slab row-group
_NEG_BIG = -1e30               # padded rows: exp(phi) underflows to 0 -> zero contribution
_SOFTPLUS_T = 30.0             # above this, softplus(x) == x to f32 precision


# --------------------------------------------------------------------------------------
# Kernel
# --------------------------------------------------------------------------------------
def _loglik_kernel(gamma_ref, beta_ref, stream_ref, out_ref, *, r, k, p):
    """stream_ref: (2k+p+2, tile_rows, 128) fused feature-major slab.

    Row layout: [0:k) = t_splines^T, [k:2k) = t_spline_derivatives^T,
                [2k:2k+p) = z^T, [2k+p] = gx, [2k+p+1] = delta.
    gamma_ref: (1, k) f32 in SMEM, beta_ref: (1, p) f32 in SMEM.
    """
    f32 = jnp.float32

    # H_t, H'_t, z @ beta as dense broadcast-multiply-adds over the feature axis
    # (pure VPU, lane-dense; upcast each loaded slab to f32 right after load).
    g0 = gamma_ref[0, 0]
    h_t = g0 * stream_ref[0].astype(f32)
    h_t_deriv = g0 * stream_ref[k].astype(f32)
    for i in range(1, k):
        g_i = gamma_ref[0, i]
        h_t = h_t + g_i * stream_ref[i].astype(f32)
        h_t_deriv = h_t_deriv + g_i * stream_ref[k + i].astype(f32)

    zbeta = beta_ref[0, 0] * stream_ref[2 * k].astype(f32)
    for j in range(1, p):
        zbeta = zbeta + beta_ref[0, j] * stream_ref[2 * k + j].astype(f32)

    gx = stream_ref[2 * k + p].astype(f32)
    delta = stream_ref[2 * k + p + 1].astype(f32)

    phi = h_t + zbeta + gx
    log_htd = jnp.log(h_t_deriv)

    if r == 0.0:
        # hazard = H'_t * exp(phi);  cumhazard = exp(phi)
        log_hazard = log_htd + phi
        cumhazard = jnp.exp(phi)
    else:  # r > 0
        # s = log(1 + r*exp(phi)) = softplus(log(r) + phi), computed stably.
        x = jnp.float32(math.log(r)) + phi
        s = jnp.where(x > _SOFTPLUS_T, x,
                      jnp.log1p(jnp.exp(jnp.minimum(x, _SOFTPLUS_T))))
        log_hazard = log_htd + phi - s
        cumhazard = (1.0 / r) * s

    # Guard 0 * (-inf) -> NaN (padded rows have delta == 0 and H'_t == 0);
    # identical to delta*log(hazard) whenever hazard > 0.
    ll = jnp.where(delta > 0.0, delta * log_hazard, 0.0) - cumhazard

    # Per-lane partial sums for this block (cross-sublane reduce only; final sum in wrapper).
    out_ref[...] = -jnp.sum(ll, axis=0, keepdims=True)  # (1, 128)


# --------------------------------------------------------------------------------------
# Block-size / VMEM-budget selection (generation aware)
# --------------------------------------------------------------------------------------
def _choose_block_and_vmem(n, k, p, stream_bytes, requested_spb=None):
    num_features = 2 * k + p + 2
    try:
        vmem_cap = int(pltpu.get_tpu_info().vmem_capacity_bytes)
    except Exception:
        vmem_cap = 64 * 1024 * 1024  # conservative: v7x per-TC VMEM

    # Per-sample VMEM cost: double-buffered fused input stream + ~8 live f32 temporaries.
    per_sample = 2 * num_features * stream_bytes + 8 * 4
    budget = int(vmem_cap * 0.75)
    max_spb = max(_MIN_BLOCK, (budget // per_sample) // _MIN_BLOCK * _MIN_BLOCK)

    n_ceil = ((n + _MIN_BLOCK - 1) // _MIN_BLOCK) * _MIN_BLOCK

    if requested_spb is not None:
        spb = max(_MIN_BLOCK, (int(requested_spb) // _MIN_BLOCK) * _MIN_BLOCK)
        spb = min(spb, max_spb, n_ceil)
    else:
        spb = min(128 * 1024, max_spb, n_ceil)
        # Megacore heuristic: aim for >= 4 blocks (>= 2 steps per TC on v7x) when n allows.
        if n_ceil >= 4 * _MIN_BLOCK:
            spb = min(spb, max(_MIN_BLOCK, (n_ceil // 4) // _MIN_BLOCK * _MIN_BLOCK))

    vmem_limit = per_sample * spb + (4 << 20)         # + headroom for output / misc
    vmem_limit = int(min(vmem_cap, max(vmem_limit, 16 << 20)))
    return spb, vmem_limit


# --------------------------------------------------------------------------------------
# One-time data relayout (call once per dataset, outside the optimizer loop)
# --------------------------------------------------------------------------------------
def prepare_loglik_data(gx, z, t_splines, t_spline_derivatives, delta, *,
                        samples_per_block=None, stream_dtype=jnp.float32):
    f32 = jnp.float32
    n, p = z.shape
    k = t_splines.shape[1]
    stream_bytes = jnp.dtype(stream_dtype).itemsize

    spb, vmem_limit = _choose_block_and_vmem(n, k, p, stream_bytes, samples_per_block)
    n_pad = ((n + spb - 1) // spb) * spb
    num_blocks = n_pad // spb
    tile_rows = spb // LANES
    rows = n_pad // LANES
    pad = n_pad - n

    def pad1(x, value):
        return jnp.pad(x.astype(f32), ((0, pad),), constant_values=value)

    def pad2(x):
        return jnp.pad(x.astype(f32), ((0, pad), (0, 0)))

    # Fused feature-major stream: (2k+p+2, n_pad) -> (2k+p+2, rows, 128).
    stream = jnp.concatenate([
        pad2(t_splines).T,
        pad2(t_spline_derivatives).T,
        pad2(z).T,
        pad1(gx, _NEG_BIG)[None, :],
        pad1(delta, 0.0)[None, :],
    ], axis=0)
    stream = stream.astype(stream_dtype).reshape(2 * k + p + 2, rows, LANES)

    return dict(stream=stream, k=k, p=p, n=n, n_pad=n_pad, spb=spb,
                num_blocks=num_blocks, tile_rows=tile_rows,
                vmem_limit=vmem_limit, stream_bytes=stream_bytes)


# --------------------------------------------------------------------------------------
# Per-evaluation entry point (cheap: only beta / gamma_tilde change)
# --------------------------------------------------------------------------------------
def log_likelihood_from_prepared(beta, gamma_tilde, prep, r):
    f32 = jnp.float32
    k, p = prep["k"], prep["p"]
    num_features = 2 * k + p + 2
    num_blocks = prep["num_blocks"]
    tile_rows = prep["tile_rows"]
    n_pad = prep["n_pad"]

    # gamma[0] = gamma_tilde[0]; gamma[1:] = exp(gamma_tilde[1:]); gamma = cumsum(gamma).
    gt = gamma_tilde.astype(f32)
    gamma = jnp.cumsum(jnp.concatenate([gt[:1], jnp.exp(gt[1:])]))
    gamma2 = gamma.reshape(1, k)
    beta2 = beta.astype(f32).reshape(1, p)

    smem_spec = pl.BlockSpec(memory_space=pltpu.MemorySpace.SMEM)
    grid_spec = pltpu.PrefetchScalarGridSpec(
        num_scalar_prefetch=0,
        grid=(num_blocks,),
        in_specs=[
            smem_spec,                                                        # gamma (resident)
            smem_spec,                                                        # beta  (resident)
            pl.BlockSpec((num_features, tile_rows, LANES), lambda i: (0, i, 0)),  # fused stream
        ],
        out_specs=pl.BlockSpec((1, LANES), lambda i: (i, 0)),                 # per-block partials
    )

    cost = pl.CostEstimate(
        flops=int((4 * k + 2 * p + 10) * n_pad),
        transcendentals=int(3 * n_pad),
        bytes_accessed=int(num_features * n_pad * prep["stream_bytes"]
                           + 4 * (k + p) + 4 * num_blocks * LANES),
    )

    partial_sums = pl.pallas_call(
        functools.partial(_loglik_kernel, r=float(r), k=k, p=p),
        out_shape=jax.ShapeDtypeStruct((num_blocks, LANES), f32),
        grid_spec=grid_spec,
        compiler_params=pltpu.CompilerParams(
            dimension_semantics=("parallel",),      # independent blocks -> 2 TCs on v7x
            vmem_limit_bytes=prep["vmem_limit"],
        ),
        cost_estimate=cost,
    )(gamma2, beta2, prep["stream"])

    return jnp.sum(partial_sums)


def log_likelihood_pallas(beta, gamma_tilde, gx, z, t_splines, t_spline_derivatives,
                          delta, r, *, samples_per_block=None, stream_dtype=jnp.float32):
    """Convenience one-shot wrapper (relayout + evaluate).  For optimizer loops with
    fixed data and changing (beta, gamma_tilde), call prepare_loglik_data() once and
    log_likelihood_from_prepared() per step instead."""
    prep = prepare_loglik_data(gx, z, t_splines, t_spline_derivatives, delta,
                               samples_per_block=samples_per_block,
                               stream_dtype=stream_dtype)
    return log_likelihood_from_prepared(beta, gamma_tilde, prep, r)


# --------------------------------------------------------------------------------------
# Pure-JAX reference (mirrors the PyTorch module)
# --------------------------------------------------------------------------------------
def log_likelihood_ref(beta, gamma_tilde, gx, z, t_splines, t_spline_derivatives,
                       delta, r):
    gamma = jnp.concatenate([gamma_tilde[:1], jnp.exp(gamma_tilde[1:])])
    gamma = jnp.cumsum(gamma, axis=0)
    H_t = t_splines @ gamma
    H_t_deriv = t_spline_derivatives @ gamma
    phi_t = H_t + z @ beta + gx
    if r == 0:
        hazard = H_t_deriv * jnp.exp(phi_t)
        cumhazard = jnp.exp(phi_t)
    else:
        hazard = H_t_deriv * jnp.exp(phi_t) / (1.0 + r * jnp.exp(phi_t))
        cumhazard = jnp.log(1.0 + r * jnp.exp(phi_t)) / r
    return -(delta * jnp.log(hazard) - cumhazard).sum()


def _make_inputs(key, n, p, k):
    keys = jax.random.split(key, 7)
    beta = 0.1 * jax.random.normal(keys[0], (p,), dtype=jnp.float32)
    # first gamma_tilde entry positive so the cumulative baseline hazard stays > 0
    gamma_tail = 0.1 * jax.random.normal(keys[1], (k - 1,), dtype=jnp.float32)
    gamma_tilde = jnp.concatenate([jnp.array([0.3], dtype=jnp.float32), gamma_tail])
    gx = 0.1 * jax.random.normal(keys[2], (n,), dtype=jnp.float32)
    z = jax.random.normal(keys[3], (n, p), dtype=jnp.float32)
    t_splines = jax.random.uniform(keys[4], (n, k), minval=0.0, maxval=1.0,
                                   dtype=jnp.float32)
    t_spline_derivatives = jax.random.uniform(keys[5], (n, k), minval=0.1,
                                              maxval=1.0, dtype=jnp.float32)
    delta = (jax.random.uniform(keys[6], (n,)) > 0.5).astype(jnp.float32)
    return beta, gamma_tilde, gx, z, t_splines, t_spline_derivatives, delta


if __name__ == "__main__":
    key = jax.random.PRNGKey(0)
    k1, k2 = jax.random.split(key)

    cases = [
        # (inputs, samples_per_block, stream_dtype, rtol, atol)
        (_make_inputs(k1, n=300, p=8, k=8), None, jnp.float32, 1e-4, 1e-3),
        (_make_inputs(k2, n=2500, p=5, k=6), 1024, jnp.float32, 1e-4, 1e-3),
        (_make_inputs(k2, n=2500, p=5, k=6), 1024, jnp.bfloat16, 2e-2, 1e-1),
    ]

    for args, spb, sdt, rtol, atol in cases:
        beta, gamma_tilde, gx, z, ts, tsd, delta = args
        prep = prepare_loglik_data(gx, z, ts, tsd, delta,
                                   samples_per_block=spb, stream_dtype=sdt)
        for r in (0.0, 0.5):
            out = log_likelihood_from_prepared(beta, gamma_tilde, prep, r)
            out = jax.block_until_ready(out)
            ref = log_likelihood_ref(beta, gamma_tilde, gx, z, ts, tsd, delta, r)
            assert jnp.isfinite(out), f"non-finite result for r={r}, dtype={sdt}"
            assert jnp.allclose(out, ref, rtol=rtol, atol=atol), (
                f"mismatch r={r}, spb={spb}, dtype={sdt}: pallas={out} ref={ref}")

    # Also exercise the one-shot convenience wrapper once.
    beta, gamma_tilde, gx, z, ts, tsd, delta = cases[0][0]
    out = jax.block_until_ready(
        log_likelihood_pallas(beta, gamma_tilde, gx, z, ts, tsd, delta, 0.5))
    ref = log_likelihood_ref(beta, gamma_tilde, gx, z, ts, tsd, delta, 0.5)
    assert jnp.allclose(out, ref, rtol=1e-4, atol=1e-3)

    print("KERNEL_OK")
</pallas_src>

<mosaic_0001>
module attributes {stable_mosaic.version = 11 : i64} {
  func.func @_loglik_kernel(%arg0: i32, %arg1: memref<1x8xf32, #tpu.memory_space<smem>>, %arg2: memref<1x8xf32, #tpu.memory_space<smem>>, %arg3: memref<26x8x128xf32, #tpu.memory_space<vmem>>, %arg4: memref<1x128xf32, #tpu.memory_space<vmem>>) attributes {dimension_semantics = [#tpu.dimension_semantics<parallel>], iteration_bounds = array<i64: 1>, scalar_prefetch = 0 : i64, scratch_operands = 0 : i64, tpu.core_type = #tpu.core_type<tc>, window_params = [{transform_indices = @transform_0, window_bounds = array<i64: 1, 8>}, {transform_indices = @transform_1, window_bounds = array<i64: 1, 8>}, {transform_indices = @transform_2, window_bounds = array<i64: 26, 8, 128>}, {transform_indices = @transform_3, window_bounds = array<i64: 1, 128>}]} {
    %c0 = arith.constant 0 : index
    %c0_0 = arith.constant 0 : index
    %0 = memref.load %arg1[%c0, %c0_0] : memref<1x8xf32, #tpu.memory_space<smem>>
    %c0_1 = arith.constant 0 : index
    %c0_2 = arith.constant 0 : index
    %c0_3 = arith.constant 0 : index
    %1 = vector.load %arg3[%c0_1, %c0_2, %c0_3] : memref<26x8x128xf32, #tpu.memory_space<vmem>>, vector<1x8x128xf32>
    %2 = vector.shape_cast %1 : vector<1x8x128xf32> to vector<8x128xf32>
    %3 = vector.broadcast %0 : f32 to vector<8x128xf32>
    %4 = arith.mulf %3, %2 : vector<8x128xf32>
    %c8 = arith.constant 8 : index
    %c0_4 = arith.constant 0 : index
    %c0_5 = arith.constant 0 : index
    %5 = vector.load %arg3[%c8, %c0_4, %c0_5] : memref<26x8x128xf32, #tpu.memory_space<vmem>>, vector<1x8x128xf32>
    %6 = vector.shape_cast %5 : vector<1x8x128xf32> to vector<8x128xf32>
    %7 = vector.broadcast %0 : f32 to vector<8x128xf32>
    %8 = arith.mulf %7, %6 : vector<8x128xf32>
    %c0_6 = arith.constant 0 : index
    %c1 = arith.constant 1 : index
    %9 = memref.load %arg1[%c0_6, %c1] : memref<1x8xf32, #tpu.memory_space<smem>>
    %c1_7 = arith.constant 1 : index
    %c0_8 = arith.constant 0 : index
    %c0_9 = arith.constant 0 : index
    %10 = vector.load %arg3[%c1_7, %c0_8, %c0_9] : memref<26x8x128xf32, #tpu.memory_space<vmem>>, vector<1x8x128xf32>
    %11 = vector.shape_cast %10 : vector<1x8x128xf32> to vector<8x128xf32>
    %12 = vector.broadcast %9 : f32 to vector<8x128xf32>
    %13 = arith.mulf %12, %11 : vector<8x128xf32>
    %14 = arith.addf %4, %13 : vector<8x128xf32>
    %c9 = arith.constant 9 : index
    %c0_10 = arith.constant 0 : index
    %c0_11 = arith.constant 0 : index
    %15 = vector.load %arg3[%c9, %c0_10, %c0_11] : memref<26x8x128xf32, #tpu.memory_space<vmem>>, vector<1x8x128xf32>
    %16 = vector.shape_cast %15 : vector<1x8x128xf32> to vector<8x128xf32>
    %17 = vector.broadcast %9 : f32 to vector<8x128xf32>
    %18 = arith.mulf %17, %16 : vector<8x128xf32>
    %19 = arith.addf %8, %18 : vector<8x128xf32>
    %c0_12 = arith.constant 0 : index
    %c2 = arith.constant 2 : index
    %20 = memref.load %arg1[%c0_12, %c2] : memref<1x8xf32, #tpu.memory_space<smem>>
    %c2_13 = arith.constant 2 : index
    %c0_14 = arith.constant 0 : index
    %c0_15 = arith.constant 0 : index
    %21 = vector.load %arg3[%c2_13, %c0_14, %c0_15] : memref<26x8x128xf32, #tpu.memory_space<vmem>>, vector<1x8x128xf32>
    %22 = vector.shape_cast %21 : vector<1x8x128xf32> to vector<8x128xf32>
    %23 = vector.broadcast %20 : f32 to vector<8x128xf32>
    %24 = arith.mulf %23, %22 : vector<8x128xf32>
    %25 = arith.addf %14, %24 : vector<8x128xf32>
    %c10 = arith.constant 10 : index
    %c0_16 = arith.constant 0 : index
    %c0_17 = arith.constant 0 : index
    %26 = vector.load %arg3[%c10, %c0_16, %c0_17] : memref<26x8x128xf32, #tpu.memory_space<vmem>>, vector<1x8x128xf32>
    %27 = vector.shape_cast %26 : vector<1x8x128xf32> to vector<8x128xf32>
    %28 = vector.broadcast %20 : f32 to vector<8x128xf32>
    %29 = arith.mulf %28, %27 : vector<8x128xf32>
    %30 = arith.addf %19, %29 : vector<8x128xf32>
    %c0_18 = arith.constant 0 : index
    %c3 = arith.constant 3 : index
    %31 = memref.load %arg1[%c0_18, %c3] : memref<1x8xf32, #tpu.memory_space<smem>>
    %c3_19 = arith.constant 3 : index
    %c0_20 = arith.constant 0 : index
    %c0_21 = arith.constant 0 : index
    %32 = vector.load %arg3[%c3_19, %c0_20, %c0_21] : memref<26x8x128xf32, #tpu.memory_space<vmem>>, vector<1x8x128xf32>
    %33 = vector.shape_cast %32 : vector<1x8x128xf32> to vector<8x128xf32>
    %34 = vector.broadcast %31 : f32 to vector<8x128xf32>
    %35 = arith.mulf %34, %33 : vector<8x128xf32>
    %36 = arith.addf %25, %35 : vector<8x128xf32>
    %c11 = arith.constant 11 : index
    %c0_22 = arith.constant 0 : index
    %c0_23 = arith.constant 0 : index
    %37 = vector.load %arg3[%c11, %c0_22, %c0_23] : memref<26x8x128xf32, #tpu.memory_space<vmem>>, vector<1x8x128xf32>
    %38 = vector.shape_cast %37 : vector<1x8x128xf32> to vector<8x128xf32>
    %39 = vector.broadcast %31 : f32 to vector<8x128xf32>
    %40 = arith.mulf %39, %38 : vector<8x128xf32>
    %41 = arith.addf %30, %40 : vector<8x128xf32>
    %c0_24 = arith.constant 0 : index
    %c4 = arith.constant 4 : index
    %42 = memref.load %arg1[%c0_24, %c4] : memref<1x8xf32, #tpu.memory_space<smem>>
    %c4_25 = arith.constant 4 : index
    %c0_26 = arith.constant 0 : index
    %c0_27 = arith.constant 0 : index
    %43 = vector.load %arg3[%c4_25, %c0_26, %c0_27] : memref<26x8x128xf32, #tpu.memory_space<vmem>>, vector<1x8x128xf32>
    %44 = vector.shape_cast %43 : vector<1x8x128xf32> to vector<8x128xf32>
    %45 = vector.broadcast %42 : f32 to vector<8x128xf32>
    %46 = arith.mulf %45, %44 : vector<8x128xf32>
    %47 = arith.addf %36, %46 : vector<8x128xf32>
    %c12 = arith.constant 12 : index
    %c0_28 = arith.constant 0 : index
    %c0_29 = arith.constant 0 : index
    %48 = vector.load %arg3[%c12, %c0_28, %c0_29] : memref<26x8x128xf32, #tpu.memory_space<vmem>>, vector<1x8x128xf32>
    %49 = vector.shape_cast %48 : vector<1x8x128xf32> to vector<8x128xf32>
    %50 = vector.broadcast %42 : f32 to vector<8x128xf32>
    %51 = arith.mulf %50, %49 : vector<8x128xf32>
    %52 = arith.addf %41, %51 : vector<8x128xf32>
    %c0_30 = arith.constant 0 : index
    %c5 = arith.constant 5 : index
    %53 = memref.load %arg1[%c0_30, %c5] : memref<1x8xf32, #tpu.memory_space<smem>>
    %c5_31 = arith.constant 5 : index
    %c0_32 = arith.constant 0 : index
    %c0_33 = arith.constant 0 : index
    %54 = vector.load %arg3[%c5_31, %c0_32, %c0_33] : memref<26x8x128xf32, #tpu.memory_space<vmem>>, vector<1x8x128xf32>
    %55 = vector.shape_cast %54 : vector<1x8x128xf32> to vector<8x128xf32>
    %56 = vector.broadcast %53 : f32 to vector<8x128xf32>
    %57 = arith.mulf %56, %55 : vector<8x128xf32>
    %58 = arith.addf %47, %57 : vector<8x128xf32>
    %c13 = arith.constant 13 : index
    %c0_34 = arith.constant 0 : index
    %c0_35 = arith.constant 0 : index
    %59 = vector.load %arg3[%c13, %c0_34, %c0_35] : memref<26x8x128xf32, #tpu.memory_space<vmem>>, vector<1x8x128xf32>
    %60 = vector.shape_cast %59 : vector<1x8x128xf32> to vector<8x128xf32>
    %61 = vector.broadcast %53 : f32 to vector<8x128xf32>
    %62 = arith.mulf %61, %60 : vector<8x128xf32>
    %63 = arith.addf %52, %62 : vector<8x128xf32>
    %c0_36 = arith.constant 0 : index
    %c6 = arith.constant 6 : index
    %64 = memref.load %arg1[%c0_36, %c6] : memref<1x8xf32, #tpu.memory_space<smem>>
    %c6_37 = arith.constant 6 : index
    %c0_38 = arith.constant 0 : index
    %c0_39 = arith.constant 0 : index
    %65 = vector.load %arg3[%c6_37, %c0_38, %c0_39] : memref<26x8x128xf32, #tpu.memory_space<vmem>>, vector<1x8x128xf32>
    %66 = vector.shape_cast %65 : vector<1x8x128xf32> to vector<8x128xf32>
    %67 = vector.broadcast %64 : f32 to vector<8x128xf32>
    %68 = arith.mulf %67, %66 : vector<8x128xf32>
    %69 = arith.addf %58, %68 : vector<8x128xf32>
    %c14 = arith.constant 14 : index
    %c0_40 = arith.constant 0 : index
    %c0_41 = arith.constant 0 : index
    %70 = vector.load %arg3[%c14, %c0_40, %c0_41] : memref<26x8x128xf32, #tpu.memory_space<vmem>>, vector<1x8x128xf32>
    %71 = vector.shape_cast %70 : vector<1x8x128xf32> to vector<8x128xf32>
    %72 = vector.broadcast %64 : f32 to vector<8x128xf32>
    %73 = arith.mulf %72, %71 : vector<8x128xf32>
    %74 = arith.addf %63, %73 : vector<8x128xf32>
    %c0_42 = arith.constant 0 : index
    %c7 = arith.constant 7 : index
    %75 = memref.load %arg1[%c0_42, %c7] : memref<1x8xf32, #tpu.memory_space<smem>>
    %c7_43 = arith.constant 7 : index
    %c0_44 = arith.constant 0 : index
    %c0_45 = arith.constant 0 : index
    %76 = vector.load %arg3[%c7_43, %c0_44, %c0_45] : memref<26x8x128xf32, #tpu.memory_space<vmem>>, vector<1x8x128xf32>
    %77 = vector.shape_cast %76 : vector<1x8x128xf32> to vector<8x128xf32>
    %78 = vector.broadcast %75 : f32 to vector<8x128xf32>
    %79 = arith.mulf %78, %77 : vector<8x128xf32>
    %80 = arith.addf %69, %79 : vector<8x128xf32>
    %c15 = arith.constant 15 : index
    %c0_46 = arith.constant 0 : index
    %c0_47 = arith.constant 0 : index
    %81 = vector.load %arg3[%c15, %c0_46, %c0_47] : memref<26x8x128xf32, #tpu.memory_space<vmem>>, vector<1x8x128xf32>
    %82 = vector.shape_cast %81 : vector<1x8x128xf32> to vector<8x128xf32>
    %83 = vector.broadcast %75 : f32 to vector<8x128xf32>
    %84 = arith.mulf %83, %82 : vector<8x128xf32>
    %85 = arith.addf %74, %84 : vector<8x128xf32>
    %c0_48 = arith.constant 0 : index
    %c0_49 = arith.constant 0 : index
    %86 = memref.load %arg2[%c0_48, %c0_49] : memref<1x8xf32, #tpu.memory_space<smem>>
    %c16 = arith.constant 16 : index
    %c0_50 = arith.constant 0 : index
    %c0_51 = arith.constant 0 : index
    %87 = vector.load %arg3[%c16, %c0_50, %c0_51] : memref<26x8x128xf32, #tpu.memory_space<vmem>>, vector<1x8x128xf32>
    %88 = vector.shape_cast %87 : vector<1x8x128xf32> to vector<8x128xf32>
    %89 = vector.broadcast %86 : f32 to vector<8x128xf32>
    %90 = arith.mulf %89, %88 : vector<8x128xf32>
    %c0_52 = arith.constant 0 : index
    %c1_53 = arith.constant 1 : index
    %91 = memref.load %arg2[%c0_52, %c1_53] : memref<1x8xf32, #tpu.memory_space<smem>>
    %c17 = arith.constant 17 : index
    %c0_54 = arith.constant 0 : index
    %c0_55 = arith.constant 0 : index
    %92 = vector.load %arg3[%c17, %c0_54, %c0_55] : memref<26x8x128xf32, #tpu.memory_space<vmem>>, vector<1x8x128xf32>
    %93 = vector.shape_cast %92 : vector<1x8x128xf32> to vector<8x128xf32>
    %94 = vector.broadcast %91 : f32 to vector<8x128xf32>
    %95 = arith.mulf %94, %93 : vector<8x128xf32>
    %96 = arith.addf %90, %95 : vector<8x128xf32>
    %c0_56 = arith.constant 0 : index
    %c2_57 = arith.constant 2 : index
    %97 = memref.load %arg2[%c0_56, %c2_57] : memref<1x8xf32, #tpu.memory_space<smem>>
    %c18 = arith.constant 18 : index
    %c0_58 = arith.constant 0 : index
    %c0_59 = arith.constant 0 : index
    %98 = vector.load %arg3[%c18, %c0_58, %c0_59] : memref<26x8x128xf32, #tpu.memory_space<vmem>>, vector<1x8x128xf32>
    %99 = vector.shape_cast %98 : vector<1x8x128xf32> to vector<8x128xf32>
    %100 = vector.broadcast %97 : f32 to vector<8x128xf32>
    %101 = arith.mulf %100, %99 : vector<8x128xf32>
    %102 = arith.addf %96, %101 : vector<8x128xf32>
    %c0_60 = arith.constant 0 : index
    %c3_61 = arith.constant 3 : index
    %103 = memref.load %arg2[%c0_60, %c3_61] : memref<1x8xf32, #tpu.memory_space<smem>>
    %c19 = arith.constant 19 : index
    %c0_62 = arith.constant 0 : index
    %c0_63 = arith.constant 0 : index
    %104 = vector.load %arg3[%c19, %c0_62, %c0_63] : memref<26x8x128xf32, #tpu.memory_space<vmem>>, vector<1x8x128xf32>
    %105 = vector.shape_cast %104 : vector<1x8x128xf32> to vector<8x128xf32>
    %106 = vector.broadcast %103 : f32 to vector<8x128xf32>
    %107 = arith.mulf %106, %105 : vector<8x128xf32>
    %108 = arith.addf %102, %107 : vector<8x128xf32>
    %c0_64 = arith.constant 0 : index
    %c4_65 = arith.constant 4 : index
    %109 = memref.load %arg2[%c0_64, %c4_65] : memref<1x8xf32, #tpu.memory_space<smem>>
    %c20 = arith.constant 20 : index
    %c0_66 = arith.constant 0 : index
    %c0_67 = arith.constant 0 : index
    %110 = vector.load %arg3[%c20, %c0_66, %c0_67] : memref<26x8x128xf32, #tpu.memory_space<vmem>>, vector<1x8x128xf32>
    %111 = vector.shape_cast %110 : vector<1x8x128xf32> to vector<8x128xf32>
    %112 = vector.broadcast %109 : f32 to vector<8x128xf32>
    %113 = arith.mulf %112, %111 : vector<8x128xf32>
    %114 = arith.addf %108, %113 : vector<8x128xf32>
    %c0_68 = arith.constant 0 : index
    %c5_69 = arith.constant 5 : index
    %115 = memref.load %arg2[%c0_68, %c5_69] : memref<1x8xf32, #tpu.memory_space<smem>>
    %c21 = arith.constant 21 : index
    %c0_70 = arith.constant 0 : index
    %c0_71 = arith.constant 0 : index
    %116 = vector.load %arg3[%c21, %c0_70, %c0_71] : memref<26x8x128xf32, #tpu.memory_space<vmem>>, vector<1x8x128xf32>
    %117 = vector.shape_cast %116 : vector<1x8x128xf32> to vector<8x128xf32>
    %118 = vector.broadcast %115 : f32 to vector<8x128xf32>
    %119 = arith.mulf %118, %117 : vector<8x128xf32>
    %120 = arith.addf %114, %119 : vector<8x128xf32>
    %c0_72 = arith.constant 0 : index
    %c6_73 = arith.constant 6 : index
    %121 = memref.load %arg2[%c0_72, %c6_73] : memref<1x8xf32, #tpu.memory_space<smem>>
    %c22 = arith.constant 22 : index
    %c0_74 = arith.constant 0 : index
    %c0_75 = arith.constant 0 : index
    %122 = vector.load %arg3[%c22, %c0_74, %c0_75] : memref<26x8x128xf32, #tpu.memory_space<vmem>>, vector<1x8x128xf32>
    %123 = vector.shape_cast %122 : vector<1x8x128xf32> to vector<8x128xf32>
    %124 = vector.broadcast %121 : f32 to vector<8x128xf32>
    %125 = arith.mulf %124, %123 : vector<8x128xf32>
    %126 = arith.addf %120, %125 : vector<8x128xf32>
    %c0_76 = arith.constant 0 : index
    %c7_77 = arith.constant 7 : index
    %127 = memref.load %arg2[%c0_76, %c7_77] : memref<1x8xf32, #tpu.memory_space<smem>>
    %c23 = arith.constant 23 : index
    %c0_78 = arith.constant 0 : index
    %c0_79 = arith.constant 0 : index
    %128 = vector.load %arg3[%c23, %c0_78, %c0_79] : memref<26x8x128xf32, #tpu.memory_space<vmem>>, vector<1x8x128xf32>
    %129 = vector.shape_cast %128 : vector<1x8x128xf32> to vector<8x128xf32>
    %130 = vector.broadcast %127 : f32 to vector<8x128xf32>
    %131 = arith.mulf %130, %129 : vector<8x128xf32>
    %132 = arith.addf %126, %131 : vector<8x128xf32>
    %c24 = arith.constant 24 : index
    %c0_80 = arith.constant 0 : index
    %c0_81 = arith.constant 0 : index
    %133 = vector.load %arg3[%c24, %c0_80, %c0_81] : memref<26x8x128xf32, #tpu.memory_space<vmem>>, vector<1x8x128xf32>
    %134 = vector.shape_cast %133 : vector<1x8x128xf32> to vector<8x128xf32>
    %c25 = arith.constant 25 : index
    %c0_82 = arith.constant 0 : index
    %c0_83 = arith.constant 0 : index
    %135 = vector.load %arg3[%c25, %c0_82, %c0_83] : memref<26x8x128xf32, #tpu.memory_space<vmem>>, vector<1x8x128xf32>
    %136 = vector.shape_cast %135 : vector<1x8x128xf32> to vector<8x128xf32>
    %137 = arith.addf %80, %132 : vector<8x128xf32>
    %138 = arith.addf %137, %134 : vector<8x128xf32>
    %139 = math.log %85 : vector<8x128xf32>
    %140 = arith.addf %139, %138 : vector<8x128xf32>
    %141 = math.exp %138 : vector<8x128xf32>
    %cst = arith.constant 0.000000e+00 : f32
    %142 = vector.broadcast %cst : f32 to vector<8x128xf32>
    %143 = arith.cmpf ogt, %136, %142 : vector<8x128xf32>
    %144 = arith.mulf %136, %140 : vector<8x128xf32>
    %cst_84 = arith.constant 0.000000e+00 : f32
    %145 = vector.broadcast %cst_84 : f32 to vector<8x128xf32>
    %146 = arith.select %143, %144, %145 : vector<8x128xi1>, vector<8x128xf32>
    %147 = arith.subf %146, %141 : vector<8x128xf32>
    %cst_85 = arith.constant dense<0.000000e+00> : vector<128xf32>
    %148 = vector.multi_reduction <add>, %147, %cst_85 [0] : vector<8x128xf32> to vector<128xf32>
    %149 = vector.shape_cast %148 : vector<128xf32> to vector<1x128xf32>
    %cst_86 = arith.constant 0.000000e+00 : f32
    %150 = vector.broadcast %cst_86 : f32 to vector<1x128xf32>
    %151 = arith.subf %150, %149 : vector<1x128xf32>
    %c0_87 = arith.constant 0 : index
    %c0_88 = arith.constant 0 : index
    %152 = vector.load %arg4[%c0_87, %c0_88] : memref<1x128xf32, #tpu.memory_space<vmem>>, vector<1x128xf32>
    tpu.vector_store %arg4[%c0_87, %c0_88], %151 {strides = array<i32>} : memref<1x128xf32, #tpu.memory_space<vmem>>, vector<1x128xf32>,
    return
  }
  func.func @transform_0(%arg0: i32) -> (i32, i32) {
    %c0_i32 = arith.constant 0 : i32
    %c0_i32_0 = arith.constant 0 : i32
    %c0_i32_1 = arith.constant 0 : i32
    return %c0_i32, %c0_i32_0 : i32, i32
  }
  func.func @transform_1(%arg0: i32) -> (i32, i32) {
    %c0_i32 = arith.constant 0 : i32
    %c0_i32_0 = arith.constant 0 : i32
    %c0_i32_1 = arith.constant 0 : i32
    return %c0_i32, %c0_i32_0 : i32, i32
  }
  func.func @transform_2(%arg0: i32) -> (i32, i32, i32) {
    %c0_i32 = arith.constant 0 : i32
    %c0_i32_0 = arith.constant 0 : i32
    %c0_i32_1 = arith.constant 0 : i32
    return %c0_i32, %arg0, %c0_i32_0 : i32, i32, i32
  }
  func.func @transform_3(%arg0: i32) -> (i32, i32) {
    %c0_i32 = arith.constant 0 : i32
    %c0_i32_0 = arith.constant 0 : i32
    return %arg0, %c0_i32 : i32, i32
  }
}

</mosaic_0001>

<bundles_post_ra>
// kernel: tpu_custom_call.1
= control target key start
LH: loop header
LB: loop body
LE: loop exit
PB: predicated region body
PF: predicated region fallthrough
CT: control target
= control target key end

     0   :  { %8 = vsyncpa [#allocation5], 0  ;;  %s421_s0 = inlined_call_operand.hbm [shape: f32[1,8], index: 0, kind: input, shape index: {}]   ;;  %s422_s1 = inlined_call_operand.vmem [shape: f32[1,8], index: 1, kind: input, shape index: {}]   ;;  %s423_s2 = inlined_call_operand.hbm [shape: f32[26,8,128], index: 2, kind: input, shape index: {}]   ;;  %s424_s3 = inlined_call_operand.hbm [shape: f32[1,128], index: 3, kind: output, shape index: {}]  }
   0x1   :  { %9 = vsyncpa [#allocation6], 0 }
   0x2   :  { %10 = vsyncpa [#allocation3], 0 }
   0x3   :  { %11 = vsyncpa [#allocation4], 0  ;;  %s26_s14 = sshll.u32 %s422_s1, 4  ;;  %s240_s17 = scalar_lea.hbm %s421_s0, 16  ;;  %s27_s14 = int_to_ptr.vmem [resolvable:$true] %s26_s14 }
   0x4   :  { %p241_p0 = scmp.ne.s32.totalorder %s421_s0, %s240_s17  ;;  %p244_p1 = scmp.lt.u32.totalorder %s240_s17, %s421_s0 }
   0x6   :  { %p246_p2 = pnand %p244_p1, %p241_p0 }
   0x8   :  { %249 = shalt.err (!%p246_p2)
}
   0x9   :  { %s314_s22 = smov [#allocation2]   ;;  %s250_s1 = scalar_lea.vmem %s27_s14, 16 }
   0xa   :  { %19 = dma.hbm_to_smem %s421_s0, 16, %s314_s22, [#allocation5]  }
   0xb   :  { %p251_p3 = scmp.ne.s32.totalorder %s27_s14, %s250_s1  ;;  %p255_p4 = scmp.lt.s32.totalorder %s27_s14, %s27_s14 }
   0xc   :  { %p256_p5 = scmp.lt.s32.totalorder %s250_s1, %s250_s1 }
   0xe   :  { %p257_p6 = por %p256_p5, %p255_p4 }
  0x10   :  { %p258_p7 = pnand %p257_p6, %p251_p3 }
  0x12   :  { %261 = shalt.err (!%p258_p7)
}
  0x13   :  { %s315_s25 = smov [#allocation7]   ;;  %s316_s26 = smov [#allocation8]  }
  0x14   :  { %29 = dma.vmem_to_smem %s27_s14, 16, %s315_s25, [#allocation6]  }
  0x15   :  { %s35_s27 = sshll.u32 %s316_s26, 4  ;;  %s262_s30 = scalar_lea.hbm %s423_s2, 3328  ;;  %s36_s27 = int_to_ptr.vmem [resolvable:$true] %s35_s27 }
  0x16   :  { %p263_p8 = scmp.ne.s32.totalorder %s423_s2, %s262_s30  ;;  %p266_p9 = scmp.lt.u32.totalorder %s262_s30, %s423_s2 }
  0x18   :  { %p268_p10 = pnand %p266_p9, %p263_p8 }
  0x1a   :  { %271 = shalt.err (!%p268_p10)
}
  0x1b   :  { %s272_s7 = scalar_lea.vmem %s36_s27, 3328  ;;  %p277_p12 = scmp.lt.s32.totalorder %s36_s27, %s36_s27 }
  0x1c   :  { %p273_p11 = scmp.ne.s32.totalorder %s36_s27, %s272_s7  ;;  %p278_p13 = scmp.lt.s32.totalorder %s272_s7, %s272_s7 }
  0x1e   :  { %p279_p0 = por %p278_p13, %p277_p12 }
  0x20   :  { %p280_p1 = pnand %p279_p0, %p273_p11 }
  0x22   :  { %283 = shalt.err (!%p280_p1)
}
  0x23   :  { %s317_s8 = smov 128   ;;  %s318_s9 = smov 8  }
  0x24   :  { %41 = dma.hbm_to_vmem [thread:$0]  %s423_s2, 3328, %s36_s27, [#allocation3], %s317_s8, %s317_s8, %s318_s9  }
  0x25   :  { %306 = dma.done.wait [#allocation5], 16  }
  0x26   :  { %307 = vsyncadd [#allocation5], 4294967280 }
  0x27   :  { %308 = dma.done.wait [#allocation6], 16  }
  0x28   :  { %309 = vsyncadd [#allocation6], 4294967280 }
  0x29   :  { %310 = dma.done.wait [#allocation3], 3328  }
  0x2a   :  { %311 = vsyncadd [#allocation3], 4294963968 }
  0x2b   :  { %51 = sfence }
  0x2c   :  { %s52_s12 = sld [smem:[#allocation2]]  ;;  %s216_s13 = sld [smem:[#allocation2 + $0x1]]  ;;  %v53_v0 = vld [vmem:[#allocation8] sm:$0xff]  ;;  %v61_v2 = vld [vmem:[#allocation8 + $0x8] sm:$0xff]  ;;  %v71_v6 = vld [vmem:[#allocation8 + $0x10] sm:$0xff] }
  0x2d   :  { %s367_s14 = sld [smem:[#allocation2 + $0x2]]  ;;  %s369_s15 = sld [smem:[#allocation2 + $0x3]]  ;;  %v57_v1 = vld [vmem:[#allocation8 + $0x40] sm:$0xff]  ;;  %v66_v3 = vld [vmem:[#allocation8 + $0x48] sm:$0xff]  ;;  %v76_v7 = vld [vmem:[#allocation8 + $0x50] sm:$0xff] }
  0x2e   :  { %s371_s16 = sld [smem:[#allocation2 + $0x4]]  ;;  %s373_s17 = sld [smem:[#allocation2 + $0x5]]  ;;  %v81_v12 = vld [vmem:[#allocation8 + $0x18] sm:$0xff]  ;;  %v91_v16 = vld [vmem:[#allocation8 + $0x20] sm:$0xff]  ;;  %v101_v25 = vld [vmem:[#allocation8 + $0x28] sm:$0xff] }
  0x2f   :  { %s375_s2 = sld [smem:[#allocation2 + $0x6]]  ;;  %s377_s18 = sld [smem:[#allocation2 + $0x7]]  ;;  %v86_v13 = vld [vmem:[#allocation8 + $0x58] sm:$0xff]  ;;  %v96_v17 = vld [vmem:[#allocation8 + $0x60] sm:$0xff]  ;;  %v106_v27 = vld [vmem:[#allocation8 + $0x68] sm:$0xff] }
  0x30   :  { %s379_s19 = sld [smem:[#allocation7]]  ;;  %s381_s20 = sld [smem:[#allocation7 + $0x1]]  ;;  %v116_v32 = vld [vmem:[#allocation8 + $0x70] sm:$0xff]  ;;  %v131_v34 = vld [vmem:[#allocation8 + $0x80] sm:$0xff]  ;;  %v136_v35 = vld [vmem:[#allocation8 + $0x88] sm:$0xff] }
  0x31   :  { %s383_s21 = sld [smem:[#allocation7 + $0x2]]  ;;  %s387_s22 = sld [smem:[#allocation7 + $0x3]]  ;;  %v126_v42 = vld [vmem:[#allocation8 + $0x78] sm:$0xff]  ;;  %v142_v45 = vld [vmem:[#allocation8 + $0x90] sm:$0xff]  ;;  %v154_v54 = vld [vmem:[#allocation8 + $0xa0] sm:$0xff] }
  0x32   :  { %v54_v4 = vstv %s52_s12  ;;  %v62_v5 = vstv %s216_s13  ;;  %s389_s23 = sld [smem:[#allocation7 + $0x4]]  ;;  %s393_s24 = sld [smem:[#allocation7 + $0x5]]  ;;  %v111_v48 = vld [vmem:[#allocation8 + $0x30] sm:$0xff]  ;;  %v148_v51 = vld [vmem:[#allocation8 + $0x98] sm:$0xff]  ;;  %v160_v62 = vld [vmem:[#allocation8 + $0xa8] sm:$0xff] }
  0x33   :  { %v55_v8 = vmul.f32 %v54_v4, %v53_v0  ;;  %v58_v9 = vmul.f32 %v57_v1, %v54_v4  ;;  %v63_v10 = vmul.f32 %v62_v5, %v61_v2  ;;  %v67_v11 = vmul.f32 %v66_v3, %v62_v5  ;;  %s396_s1 = sld [smem:[#allocation7 + $0x6]]  ;;  %s401_s25 = sld [smem:[#allocation7 + $0x7]]  ;;  %v121_v2 = vld [vmem:[#allocation8 + $0x38] sm:$0xff]  ;;  %v166_v5 = vld [vmem:[#allocation8 + $0xb0] sm:$0xff] }
  0x34   :  { %v72_v14 = vstv %s367_s14  ;;  %v82_v15 = vstv %s369_s15  ;;  %v92_v24 = vstv %s371_s16  ;;  %v102_v26 = vstv %s373_s17  ;;  %s319_s26 = smov [#allocation9]  }
  0x35   :  { %v64_v18 = vadd.f32 %v63_v10, %v55_v8  ;;  %v68_v19 = vadd.f32 %v67_v11, %v58_v9  ;;  %v73_v20 = vmul.f32 %v72_v14, %v71_v6  ;;  %v77_v21 = vmul.f32 %v76_v7, %v72_v14  ;;  %v172_v11 = vld [vmem:[#allocation8 + $0xb8] sm:$0xff]  ;;  %s205_s27 = sshll.u32 %s319_s26, 4  ;;  %s206_s27 = int_to_ptr.vmem [resolvable:$true] %s205_s27 }
  0x36   :  { %v83_v22 = vmul.f32 %v82_v15, %v81_v12  ;;  %v87_v23 = vmul.f32 %v86_v13, %v82_v15  ;;  %v93_v30 = vmul.f32 %v92_v24, %v91_v16  ;;  %v97_v31 = vmul.f32 %v96_v17, %v92_v24  ;;  %s284_s28 = scalar_lea.vmem %s206_s27, 16  ;;  %s288_s29 = scalar_lea.vmem %s206_s27, 32 }
  0x37   :  { %v74_v28 = vadd.f32 %v73_v20, %v64_v18  ;;  %v78_v29 = vadd.f32 %v77_v21, %v68_v19  ;;  %v112_v33 = vstv %s375_s2  ;;  %v103_v38 = vmul.f32 %v102_v26, %v101_v25  ;;  %v177_v21 = vld [vmem:[#allocation8 + $0xc0] sm:$0xff]  ;;  %p285_p2 = scmp.ne.s32.totalorder %s206_s27, %s284_s28  ;;  %p289_p3 = scmp.lt.s32.totalorder %s206_s27, %s206_s27 }
  0x38   :  { %v107_v39 = vmul.f32 %v106_v27, %v102_v26  ;;  %v117_v40 = vmul.f32 %v116_v32, %v112_v33  ;;  %v122_v41 = vstv %s377_s18  ;;  %v132_v43 = vstv %s379_s19  ;;  %p290_p4 = scmp.lt.s32.totalorder %s288_s29, %s284_s28 }
  0x39   :  { %v84_v36 = vadd.f32 %v83_v22, %v74_v28  ;;  %v88_v37 = vadd.f32 %v87_v23, %v78_v29  ;;  %v137_v44 = vstv %s381_s20  ;;  %v133_v49 = vmul.f32 %v132_v43, %v131_v34  ;;  %v179_v28 = vld [vmem:[#allocation8 + $0xc8] sm:$0xff] }
  0x3a   :  { %v138_v50 = vmul.f32 %v137_v44, %v136_v35  ;;  %v143_v52 = vstv %s383_s21  ;;  %v149_v53 = vstv %s387_s22  ;;  %v155_v55 = vstv %s389_s23  ;;  %p291_p5 = por %p290_p4, %p289_p3 }
  0x3b   :  { %v94_v46 = vadd.f32 %v93_v30, %v84_v36  ;;  %v98_v47 = vadd.f32 %v97_v31, %v88_v37  ;;  %v127_v57 = vmul.f32 %v126_v42, %v122_v41  ;;  %v144_v59 = vmul.f32 %v143_v52, %v142_v45 }
  0x3c   :  { %v139_v58 = vadd.f32 %v138_v50, %v133_v49  ;;  %v113_v60 = vmul.f32 %v112_v33, %v111_v48  ;;  %v150_v61 = vmul.f32 %v149_v53, %v148_v51  ;;  %v161_v63 = vstv %s393_s24  ;;  %p292_p6 = pnand %p291_p5, %p285_p2 }
  0x3d   :  { %v108_v56 = vadd.f32 %v107_v39, %v98_v47  ;;  %v104_v0 = vadd.f32 %v103_v38, %v94_v46  ;;  %v156_v4 = vmul.f32 %v155_v55, %v154_v54  ;;  %v167_v6 = vstv %s396_s1 }
  0x3e   :  { %v145_v3 = vadd.f32 %v144_v59, %v139_v58  ;;  %v162_v9 = vmul.f32 %v161_v63, %v160_v62  ;;  %v123_v10 = vmul.f32 %v122_v41, %v121_v2  ;;  %v173_v12 = vstv %s401_s25 }
  0x3f   :  { %v118_v1 = vadd.f32 %v117_v40, %v108_v56  ;;  %v114_v13 = vadd.f32 %v113_v60, %v104_v0  ;;  %v168_v15 = vmul.f32 %v167_v6, %v166_v5  ;;  %v174_v17 = vmul.f32 %v173_v12, %v172_v11 }
  0x40   :  { %v151_v8 = vadd.f32 %v150_v61, %v145_v3  ;;  %vm187_vm0 = vcmp.gt.f32.partialorder %v179_v28, 0.0 }
  0x41   :  { %v128_v7 = vadd.f32 %v127_v57, %v118_v1  ;;  %v124_v18 = vadd.f32 %v123_v10, %v114_v13 }
  0x42   :  { %v157_v14 = vadd.f32 %v156_v4, %v151_v8 }
  0x43   :  { %236 = vlog2.f32 %v128_v7 }
  0x44   :  { %v163_v16 = vadd.f32 %v162_v9, %v157_v14 }
  0x46   :  { %v169_v19 = vadd.f32 %v168_v15, %v163_v16 }
  0x48   :  { %v175_v20 = vadd.f32 %v174_v17, %v169_v19 }
  0x4a   :  { %v180_v22 = vadd.f32 %v175_v20, %v124_v18 }
  0x4c   :  { %v181_v24 = vadd.f32 %v180_v22, %v177_v21 }
  0x4d   :  { %v237_v23 = vpop.eup %236 }
  0x4e   :  { %v183_v25 = vmul.f32 0.6931472, %v237_v23  ;;  %v185_v26 = vmul.f32 1.442695, %v181_v24 }
  0x50   :  { %v184_v27 = vadd.f32 %v183_v25, %v181_v24  ;;  %238 = vpow2.f32 %v185_v26 }
  0x52   :  { %v188_v29 = vmul.f32 %v184_v27, %v179_v28 }
  0x54   :  { %v189_v30 = vsel %vm187_vm0, %v188_v29, 0.0 }
  0x5a   :  { %v239_v31 = vpop.eup %238 }
  0x5b   :  { %v190_v32 = vsub.f32 %v189_v30, %v239_v31 }
  0x5d   :  { %v191_v33 = vrot.slane %v190_v32, 4 }
  0x5f   :  { %v192_v34 = vadd.f32 %v191_v33, %v190_v32 }
  0x61   :  { %v193_v35 = vrot.slane %v192_v34, 2 }
  0x63   :  { %v194_v36 = vadd.f32 %v193_v35, %v192_v34 }
  0x65   :  { %v195_v37 = vrot.slane %v194_v36, 1 }
  0x67   :  { %v196_v38 = vadd.f32 %v195_v37, %v194_v36 }
  0x69   :  { %v197_v39 = vsub.f32 0.0, %v196_v38 }
  0x6b   :  { %198 = vst [vmem:[#allocation9] sm:$0x1] %v197_v39 }
  0x6c   :  { %295 = shalt.err (!%p292_p6)
}
  0x6d   :  { %s296_s5 = scalar_lea.hbm %s424_s3, 16 }
  0x6e   :  { %p297_p7 = scmp.ne.s32.totalorder %s424_s3, %s296_s5  ;;  %p300_p8 = scmp.lt.u32.totalorder %s296_s5, %s424_s3 }
  0x70   :  { %p302_p9 = pnand %p300_p8, %p297_p7 }
  0x72   :  { %305 = shalt.err (!%p302_p9)
}
  0x73   :  { %208 = dma.vmem_to_hbm [thread:$0]  %s206_s27, 16, %s424_s3, [#allocation4]  }
  0x74   :  { %312 = dma.done.wait [#allocation4], 16  }
  0x75   :  { %313 = vsyncadd [#allocation4], 4294967280 }
  0x76   :  { %212 = vsyncpa [#allocation3], 1 }
  0x77   :  { %213 = vsyncpa [#allocation4], 1 }
  0x78   :  { %214 = vsyncpa [#allocation5], 1 }
  0x79   :  { %215 = vsyncpa [#allocation6], 1 }

</bundles_post_ra>
